<compile_context>
chip_gen: v5e
topology: v5e:2x2
jax: 0.10.0
libtpu: 0.0.40
codegen_flags: <defaults>
</compile_context>

<pallas_src>
import functools

import jax
import jax.numpy as jnp
from jax.experimental import pallas as pl
from jax.experimental.pallas import tpu as pltpu


def _round_up(x, m):
    return (x + m - 1) // m * m


def group_adapter_kernel(gidx_ref,       # (1,)    i32  SMEM (scalar prefetch): group idx
                         ids_ref,        # (BT,S)  i32  pre-masked token ids (-1 = masked/pad)
                         lab_ref,        # (BT,1)  i32  labels (-1 = padded row)
                         emb_ref,        # (TV,Hp) bf16 embedding chunk (streamed over V)
                         w_ref,          # (Hp,Cp) f32  classifier W (resident)
                         b_ref,          # (1,Cp)  f32  classifier bias (resident)
                         probs_ref,      # (1,NGp) f32  current adv_probs (resident)
                         probs_out_ref,  # (1,NGp) f32  updated adv_probs
                         stats_ref,      # (1,128) f32  lane0 = loss, lane1 = robust
                         pooled_ref,     # (BT,Hp) f32  scratch: bag-of-words @ emb partials
                         lrow_ref,       # (1,Cp)  f32  scratch: lane-dense CE accumulator
                         *, step_size, inv_n_real, n_classes):
    i = pl.program_id(0)              # batch tile
    k = pl.program_id(1)              # vocab chunk (innermost)
    nb = pl.num_programs(0)
    nv = pl.num_programs(1)

    bt, seq = ids_ref.shape
    tv = emb_ref.shape[0]
    cp = w_ref.shape[1]

    @pl.when(jnp.logical_and(i == 0, k == 0))
    def _init_loss():
        lrow_ref[...] = jnp.zeros_like(lrow_ref)

    @pl.when(k == 0)
    def _init_pooled():
        pooled_ref[...] = jnp.zeros_like(pooled_ref)

    ids = ids_ref[...]                                     # (BT,S) i32, masked -> -1

    # Bag-of-words counts for this vocab chunk, accumulated one token position
    # at a time so only a 2-D (BT,TV) slab is ever live (no (BT,S,V) one-hot).
    # Compare/add stay in i32/f32 on the VPU; bf16 only at the MXU boundary.
    v_ids = jax.lax.broadcasted_iota(jnp.int32, (bt, tv), 1) + k * tv
    counts = jnp.zeros((bt, tv), jnp.float32)
    for s in range(seq):                                   # static, trace-time loop
        counts = counts + (ids[:, s:s + 1] == v_ids).astype(jnp.float32)

    # Masked-sum pooling as a native-bf16 MXU matmul with f32 accumulation.
    pooled_ref[...] += jnp.dot(counts.astype(jnp.bfloat16), emb_ref[...],
                               preferred_element_type=jnp.float32)

    # ---- classifier head + CE: once per batch tile (last vocab chunk) ----
    @pl.when(k == nv - 1)
    def _head():
        denom = jnp.sum((ids >= 0).astype(jnp.float32), axis=1, keepdims=True)
        pooled = pooled_ref[...] / jnp.maximum(denom, 1.0)        # exact divide
        logits = jnp.dot(pooled, w_ref[...],
                         preferred_element_type=jnp.float32) + b_ref[...]
        c_iota = jax.lax.broadcasted_iota(jnp.int32, (bt, cp), 1)
        logits = jnp.where(c_iota < n_classes, logits, jnp.float32(-1e30))  # f32 only
        m = jnp.max(logits, axis=-1, keepdims=True)
        lse = m + jnp.log(jnp.sum(jnp.exp(logits - m), axis=-1, keepdims=True))
        y = (c_iota == lab_ref[...]).astype(jnp.float32)           # label=-1 -> all 0
        # Lane-dense CE accumulation: sublane-reduce to a (1,Cp) row (no masked
        # 1-lane stores, size independent of batch_tile).
        lrow_ref[...] += jnp.sum(y * (lse - logits), axis=0, keepdims=True)

    # ---- GroupDRO EG update + scalar outputs: very last grid step only ----
    @pl.when(jnp.logical_and(i == nb - 1, k == nv - 1))
    def _finish():
        loss = jnp.sum(lrow_ref[...], axis=1, keepdims=True) * jnp.float32(inv_n_real)

        ngp = probs_ref.shape[1]
        g_iota = jax.lax.broadcasted_iota(jnp.int32, (1, ngp), 1)
        is_g = g_iota == gidx_ref[0]
        factor = jnp.where(is_g, jnp.exp(jnp.float32(step_size) * loss),
                           jnp.float32(1.0))
        new_p = probs_ref[...] * factor                     # padded lanes stay 0
        new_p = new_p / jnp.sum(new_p, axis=1, keepdims=True)   # exact renorm
        probs_out_ref[...] = new_p

        robust = loss * jnp.sum(jnp.where(is_g, new_p, 0.0), axis=1, keepdims=True)
        lane = jax.lax.broadcasted_iota(jnp.int32, stats_ref.shape, 1)
        stats_ref[...] = jnp.where(lane == 0, loss,
                                   jnp.where(lane == 1, robust, jnp.float32(0.0)))


def group_adapter_forward(labels, input_ids, attention_mask, dialect_name,
                          params, adv_probs, idx_group, step_size, *,
                          batch_tile=256, vocab_tile=1024):
    """Functional equivalent of GroupAdapterWrapper.forward.

    Returns (robust_loss, new_adv_probs, raw_loss); the stateful adv_probs
    mutation of the PyTorch module is expressed functionally (returned).
    """
    embed, w, b = params["embed"], params["w"], params["b"]
    V, H = embed.shape
    C = w.shape[1]
    B, S = input_ids.shape
    NG1 = adv_probs.shape[0]

    if dialect_name is None:
        dialect_name = "sae"
    gidx = jnp.array([idx_group[dialect_name]], dtype=jnp.int32)

    # Lane padding (multiples of 128) and tile-aligned batch / vocab padding.
    Hp, Cp, NGp = _round_up(H, 128), _round_up(C, 128), _round_up(NG1, 128)
    bt = max(8, min(_round_up(batch_tile, 8), _round_up(B, 8)))
    Bp = _round_up(B, bt)
    tv = min(_round_up(vocab_tile, 128), _round_up(V, 128))
    Vp = _round_up(V, tv)
    nb, nv = Bp // bt, Vp // tv

    # Pre-mask ids (mask==0 / pad -> -1): drops the f32 mask multiply from the
    # kernel and makes the attention-mask tensor itself unneeded in VMEM.
    ids_m = jnp.where(attention_mask > 0, input_ids.astype(jnp.int32), -1)
    ids_p = jnp.full((Bp, S), -1, jnp.int32).at[:B].set(ids_m)
    lab_p = jnp.full((Bp, 1), -1, jnp.int32).at[:B, 0].set(labels.astype(jnp.int32))
    emb_p = jnp.zeros((Vp, Hp), jnp.bfloat16).at[:V, :H].set(
        embed.astype(jnp.bfloat16))
    w_p = jnp.zeros((Hp, Cp), jnp.float32).at[:H, :C].set(w.astype(jnp.float32))
    b_p = jnp.zeros((1, Cp), jnp.float32).at[0, :C].set(b.astype(jnp.float32))
    probs_p = jnp.zeros((1, NGp), jnp.float32).at[0, :NG1].set(
        adv_probs.astype(jnp.float32))

    # TODO(synk): step_size / 1/B are baked statically (Mosaic recompiles if they
    # change); route them through an SMEM scalar input if they vary per step.
    kernel = functools.partial(group_adapter_kernel,
                               step_size=float(step_size),
                               inv_n_real=1.0 / float(B),
                               n_classes=int(C))

    grid_spec = pltpu.PrefetchScalarGridSpec(
        num_scalar_prefetch=1,             # gidx -> SMEM
        grid=(nb, nv),                     # V innermost: emb DMA pipelines behind MXU
        in_specs=[
            pl.BlockSpec((bt, S), lambda i, k, *_: (i, 0)),     # ids
            pl.BlockSpec((bt, 1), lambda i, k, *_: (i, 0)),     # labels
            pl.BlockSpec((tv, Hp), lambda i, k, *_: (k, 0)),    # emb chunk (streamed)
            # TODO(synk): these three resident blocks are still double-buffered
            # by default (tiny); single-buffer via pipeline_mode once stable.
            pl.BlockSpec((Hp, Cp), lambda i, k, *_: (0, 0)),    # W    (resident)
            pl.BlockSpec((1, Cp), lambda i, k, *_: (0, 0)),     # bias (resident)
            pl.BlockSpec((1, NGp), lambda i, k, *_: (0, 0)),    # adv_probs
        ],
        out_specs=(
            pl.BlockSpec((1, NGp), lambda i, k, *_: (0, 0)),    # new adv_probs
            pl.BlockSpec((1, 128), lambda i, k, *_: (0, 0)),    # [loss, robust, ...]
        ),
        scratch_shapes=[pltpu.VMEM((bt, Hp), jnp.float32),      # pooled accumulator
                        pltpu.VMEM((1, Cp), jnp.float32)],      # CE accumulator
    )

    # VMEM budget: double-buffered inputs/outputs + scratch, 2x headroom.
    est = 2 * (bt * S * 4 + bt * 4 + tv * Hp * 2 + Hp * Cp * 4 + Cp * 4
               + 2 * NGp * 4 + 128 * 4) + bt * Hp * 4 + Cp * 4
    vmem_limit = int(min(64 * 2**20, max(16 * 2**20, 2 * est)))

    # TODO(synk): on v7x the batch axis could additionally be split across the
    # two TensorCores (core_map + per-core partial losses); single-core here.
    probs_out, stats = pl.pallas_call(
        kernel,
        out_shape=(jax.ShapeDtypeStruct((1, NGp), jnp.float32),
                   jax.ShapeDtypeStruct((1, 128), jnp.float32)),
        grid_spec=grid_spec,
        compiler_params=pltpu.CompilerParams(
            # batch axis carries the loss reduction / resident outputs, V axis
            # carries the pooled reduction -> both sequential.
            dimension_semantics=("arbitrary", "arbitrary"),
            vmem_limit_bytes=vmem_limit),
    )(gidx, ids_p, lab_p, emb_p, w_p, b_p, probs_p)

    loss = stats[0, 0]
    robust = stats[0, 1]
    new_probs = probs_out[0, :NG1]
    return robust, new_probs, loss


def _reference(labels, input_ids, attention_mask, dialect_name,
               params, adv_probs, idx_group, step_size):
    """Pure-JAX reference mirroring the PyTorch semantics."""
    embed = params["embed"].astype(jnp.float32)   # bf16-stored table, f32 compute
    w, b = params["w"], params["b"]
    x = jnp.take(embed, input_ids, axis=0)
    mask = attention_mask.astype(jnp.float32)
    pooled = jnp.sum(x * mask[:, :, None], axis=1) / jnp.maximum(
        jnp.sum(mask, axis=1, keepdims=True), 1.0)
    logits = pooled @ w + b
    logp = jax.nn.log_softmax(logits, axis=-1)
    loss = -jnp.mean(jnp.take_along_axis(logp, labels[:, None], axis=-1))
    g = idx_group["sae" if dialect_name is None else dialect_name]
    factor = jnp.where(jnp.arange(adv_probs.shape[0]) == g,
                       jnp.exp(step_size * loss), 1.0)
    new_p = adv_probs * factor
    new_p = new_p / new_p.sum()
    return loss * new_p[g], new_p, loss


if __name__ == "__main__":
    # Small deterministic setup consistent with the module's forward signature.
    B, S, H, C, V = 2, 8, 32, 4, 16
    dialects = ["aave", "indian", "nigerian"]
    step_size = 0.01

    n_groups = len(dialects)
    idx_group = dict(zip(dialects, range(n_groups)))
    idx_group["sae"] = n_groups
    adv_probs = jnp.ones((n_groups + 1,), jnp.float32) / (n_groups + 1)

    key = jax.random.PRNGKey(0)
    k_emb, k_w, k_b, k_ids, k_lab = jax.random.split(key, 5)
    params = {
        # Embedding table stored in bf16 (weight-storage dtype, native MXU input).
        "embed": (jax.random.normal(k_emb, (V, H), jnp.float32) * 0.1
                  ).astype(jnp.bfloat16),
        "w": jax.random.normal(k_w, (H, C), jnp.float32) * 0.1,
        "b": jax.random.normal(k_b, (C,), jnp.float32) * 0.01,
    }

    input_ids = jax.random.randint(k_ids, (B, S), 0, V, dtype=jnp.int32)
    labels = jax.random.randint(k_lab, (B,), 0, C, dtype=jnp.int32)
    attention_mask = jnp.ones((B, S), jnp.int32).at[:, S - 2:].set(0)

    robust_loss, new_probs, loss = group_adapter_forward(
        labels, input_ids, attention_mask, "aave",
        params, adv_probs, idx_group, step_size)
    jax.block_until_ready((robust_loss, new_probs, loss))

    # Sanity check against pure-JAX reference.
    r_ref, p_ref, l_ref = _reference(
        labels, input_ids, attention_mask, "aave",
        params, adv_probs, idx_group, step_size)
    assert abs(float(loss) - float(l_ref)) < 2e-3, (float(loss), float(l_ref))
    assert abs(float(robust_loss) - float(r_ref)) < 2e-3, (float(robust_loss),
                                                           float(r_ref))
    assert float(jnp.max(jnp.abs(new_probs - p_ref))) < 1e-3

    print("KERNEL_OK")
</pallas_src>

<mosaic_0001>
module attributes {stable_mosaic.version = 11 : i64} {
  func.func @group_adapter_kernel(%arg0: i32, %arg1: i32, %arg2: memref<1xi32, #tpu.memory_space<smem>>, %arg3: memref<8x8xi32, #tpu.memory_space<vmem>>, %arg4: memref<8x1xi32, #tpu.memory_space<vmem>>, %arg5: memref<128x128xbf16, #tpu.memory_space<vmem>>, %arg6: memref<128x128xf32, #tpu.memory_space<vmem>>, %arg7: memref<1x128xf32, #tpu.memory_space<vmem>>, %arg8: memref<1x128xf32, #tpu.memory_space<vmem>>, %arg9: memref<1x128xf32, #tpu.memory_space<vmem>>, %arg10: memref<1x128xf32, #tpu.memory_space<vmem>>, %arg11: memref<8x128xf32, #tpu.memory_space<vmem>>, %arg12: memref<1x128xf32, #tpu.memory_space<vmem>>) attributes {dimension_semantics = [#tpu.dimension_semantics<arbitrary>, #tpu.dimension_semantics<arbitrary>], iteration_bounds = array<i64: 1, 1>, scalar_prefetch = 1 : i64, scratch_operands = 2 : i64, tpu.core_type = #tpu.core_type<tc>, window_params = [{transform_indices = @transform_0, window_bounds = array<i64: 8, 8>}, {transform_indices = @transform_1, window_bounds = array<i64: 8, 1>}, {transform_indices = @transform_2, window_bounds = array<i64: 128, 128>}, {pipeline_mode = #tpu.pipeline_mode<synchronous>, transform_indices = @transform_3, window_bounds = array<i64: 128, 128>}, {pipeline_mode = #tpu.pipeline_mode<synchronous>, transform_indices = @transform_4, window_bounds = array<i64: 1, 128>}, {pipeline_mode = #tpu.pipeline_mode<synchronous>, transform_indices = @transform_5, window_bounds = array<i64: 1, 128>}, {pipeline_mode = #tpu.pipeline_mode<synchronous>, transform_indices = @transform_6, window_bounds = array<i64: 1, 128>}, {pipeline_mode = #tpu.pipeline_mode<synchronous>, transform_indices = @transform_7, window_bounds = array<i64: 1, 128>}]} {
    %c0_i32 = arith.constant 0 : i32
    %0 = arith.cmpi eq, %arg0, %c0_i32 : i32
    %c0_i32_0 = arith.constant 0 : i32
    %1 = arith.cmpi eq, %arg1, %c0_i32_0 : i32
    %2 = arith.andi %0, %1 : i1
    %3 = arith.extui %2 : i1 to i32
    %c0_i32_1 = arith.constant 0 : i32
    %4 = arith.cmpi ne, %3, %c0_i32_1 : i32
    scf.if %4 {
      %cst_17 = arith.constant 0.000000e+00 : f32
      %76 = vector.broadcast %cst_17 : f32 to vector<1x128xf32>
      %c0_18 = arith.constant 0 : index
      %c0_19 = arith.constant 0 : index
      %77 = vector.load %arg12[%c0_18, %c0_19] : memref<1x128xf32, #tpu.memory_space<vmem>>, vector<1x128xf32>
      tpu.vector_store %arg12[%c0_18, %c0_19], %76 {strides = array<i32>} : memref<1x128xf32, #tpu.memory_space<vmem>>, vector<1x128xf32>,
    } else {
    }
    %c0_i32_2 = arith.constant 0 : i32
    %5 = arith.cmpi eq, %arg1, %c0_i32_2 : i32
    %6 = arith.extui %5 : i1 to i32
    %c0_i32_3 = arith.constant 0 : i32
    %7 = arith.cmpi ne, %6, %c0_i32_3 : i32
    scf.if %7 {
      %cst_17 = arith.constant 0.000000e+00 : f32
      %76 = vector.broadcast %cst_17 : f32 to vector<8x128xf32>
      %c0_18 = arith.constant 0 : index
      %c0_19 = arith.constant 0 : index
      %77 = vector.load %arg11[%c0_18, %c0_19] : memref<8x128xf32, #tpu.memory_space<vmem>>, vector<8x128xf32>
      tpu.vector_store %arg11[%c0_18, %c0_19], %76 {strides = array<i32>} : memref<8x128xf32, #tpu.memory_space<vmem>>, vector<8x128xf32>,
    } else {
    }
    %c0 = arith.constant 0 : index
    %c0_4 = arith.constant 0 : index
    %8 = vector.load %arg3[%c0, %c0_4] : memref<8x8xi32, #tpu.memory_space<vmem>>, vector<8x8xi32>
    %9 = tpu.iota {dimensions = array<i32: 1>} : vector<8x128xi32>
    %c128_i32 = arith.constant 128 : i32
    %10 = arith.muli %arg1, %c128_i32 : i32
    %11 = vector.broadcast %10 : i32 to vector<8x128xi32>
    %12 = arith.addi %9, %11 : vector<8x128xi32>
    %cst = arith.constant 0.000000e+00 : f32
    %13 = vector.broadcast %cst : f32 to vector<8x128xf32>
    %14 = vector.extract_strided_slice %8 {offsets = [0, 0], sizes = [8, 1], strides = [1, 1]} : vector<8x8xi32> to vector<8x1xi32>
    %15 = vector.broadcast %14 : vector<8x1xi32> to vector<8x128xi32>
    %16 = arith.cmpi eq, %15, %12 : vector<8x128xi32>
    %17 = arith.extui %16 : vector<8x128xi1> to vector<8x128xi32>
    %18 = arith.sitofp %17 : vector<8x128xi32> to vector<8x128xf32>
    %19 = arith.addf %13, %18 : vector<8x128xf32>
    %20 = vector.extract_strided_slice %8 {offsets = [0, 1], sizes = [8, 1], strides = [1, 1]} : vector<8x8xi32> to vector<8x1xi32>
    %21 = vector.broadcast %20 : vector<8x1xi32> to vector<8x128xi32>
    %22 = arith.cmpi eq, %21, %12 : vector<8x128xi32>
    %23 = arith.extui %22 : vector<8x128xi1> to vector<8x128xi32>
    %24 = arith.sitofp %23 : vector<8x128xi32> to vector<8x128xf32>
    %25 = arith.addf %19, %24 : vector<8x128xf32>
    %26 = vector.extract_strided_slice %8 {offsets = [0, 2], sizes = [8, 1], strides = [1, 1]} : vector<8x8xi32> to vector<8x1xi32>
    %27 = vector.broadcast %26 : vector<8x1xi32> to vector<8x128xi32>
    %28 = arith.cmpi eq, %27, %12 : vector<8x128xi32>
    %29 = arith.extui %28 : vector<8x128xi1> to vector<8x128xi32>
    %30 = arith.sitofp %29 : vector<8x128xi32> to vector<8x128xf32>
    %31 = arith.addf %25, %30 : vector<8x128xf32>
    %32 = vector.extract_strided_slice %8 {offsets = [0, 3], sizes = [8, 1], strides = [1, 1]} : vector<8x8xi32> to vector<8x1xi32>
    %33 = vector.broadcast %32 : vector<8x1xi32> to vector<8x128xi32>
    %34 = arith.cmpi eq, %33, %12 : vector<8x128xi32>
    %35 = arith.extui %34 : vector<8x128xi1> to vector<8x128xi32>
    %36 = arith.sitofp %35 : vector<8x128xi32> to vector<8x128xf32>
    %37 = arith.addf %31, %36 : vector<8x128xf32>
    %38 = vector.extract_strided_slice %8 {offsets = [0, 4], sizes = [8, 1], strides = [1, 1]} : vector<8x8xi32> to vector<8x1xi32>
    %39 = vector.broadcast %38 : vector<8x1xi32> to vector<8x128xi32>
    %40 = arith.cmpi eq, %39, %12 : vector<8x128xi32>
    %41 = arith.extui %40 : vector<8x128xi1> to vector<8x128xi32>
    %42 = arith.sitofp %41 : vector<8x128xi32> to vector<8x128xf32>
    %43 = arith.addf %37, %42 : vector<8x128xf32>
    %44 = vector.extract_strided_slice %8 {offsets = [0, 5], sizes = [8, 1], strides = [1, 1]} : vector<8x8xi32> to vector<8x1xi32>
    %45 = vector.broadcast %44 : vector<8x1xi32> to vector<8x128xi32>
    %46 = arith.cmpi eq, %45, %12 : vector<8x128xi32>
    %47 = arith.extui %46 : vector<8x128xi1> to vector<8x128xi32>
    %48 = arith.sitofp %47 : vector<8x128xi32> to vector<8x128xf32>
    %49 = arith.addf %43, %48 : vector<8x128xf32>
    %50 = vector.extract_strided_slice %8 {offsets = [0, 6], sizes = [8, 1], strides = [1, 1]} : vector<8x8xi32> to vector<8x1xi32>
    %51 = vector.broadcast %50 : vector<8x1xi32> to vector<8x128xi32>
    %52 = arith.cmpi eq, %51, %12 : vector<8x128xi32>
    %53 = arith.extui %52 : vector<8x128xi1> to vector<8x128xi32>
    %54 = arith.sitofp %53 : vector<8x128xi32> to vector<8x128xf32>
    %55 = arith.addf %49, %54 : vector<8x128xf32>
    %56 = vector.extract_strided_slice %8 {offsets = [0, 7], sizes = [8, 1], strides = [1, 1]} : vector<8x8xi32> to vector<8x1xi32>
    %57 = vector.broadcast %56 : vector<8x1xi32> to vector<8x128xi32>
    %58 = arith.cmpi eq, %57, %12 : vector<8x128xi32>
    %59 = arith.extui %58 : vector<8x128xi1> to vector<8x128xi32>
    %60 = arith.sitofp %59 : vector<8x128xi32> to vector<8x128xf32>
    %61 = arith.addf %55, %60 : vector<8x128xf32>
    %c0_5 = arith.constant 0 : index
    %c0_6 = arith.constant 0 : index
    %62 = vector.load %arg11[%c0_5, %c0_6] : memref<8x128xf32, #tpu.memory_space<vmem>>, vector<8x128xf32>
    %63 = arith.truncf %61 : vector<8x128xf32> to vector<8x128xbf16>
    %c0_7 = arith.constant 0 : index
    %c0_8 = arith.constant 0 : index
    %64 = vector.load %arg5[%c0_7, %c0_8] : memref<128x128xbf16, #tpu.memory_space<vmem>>, vector<128x128xbf16>
    %cst_9 = arith.constant dense<0.000000e+00> : vector<8x128xf32>
    %65 = tpu.matmul %63, %64, %cst_9 {dimension_numbers = #tpu.dot_dimension_numbers<[1], [0], [0], [1], [0, 0, 1, 1], [], []>} : vector<8x128xbf16>, vector<128x128xbf16>, vector<8x128xf32> -> vector<8x128xf32>
    %66 = arith.addf %62, %65 : vector<8x128xf32>
    %c0_10 = arith.constant 0 : index
    %c0_11 = arith.constant 0 : index
    %67 = vector.load %arg11[%c0_10, %c0_11] : memref<8x128xf32, #tpu.memory_space<vmem>>, vector<8x128xf32>
    tpu.vector_store %arg11[%c0_10, %c0_11], %66 {strides = array<i32>} : memref<8x128xf32, #tpu.memory_space<vmem>>, vector<8x128xf32>,
    %c0_i32_12 = arith.constant 0 : i32
    %68 = arith.cmpi eq, %arg1, %c0_i32_12 : i32
    %69 = arith.extui %68 : i1 to i32
    %c0_i32_13 = arith.constant 0 : i32
    %70 = arith.cmpi ne, %69, %c0_i32_13 : i32
    scf.if %70 {
      %c0_i32_17 = arith.constant 0 : i32
      %76 = vector.broadcast %c0_i32_17 : i32 to vector<8x8xi32>
      %77 = arith.cmpi sge, %8, %76 : vector<8x8xi32>
      %78 = arith.extui %77 : vector<8x8xi1> to vector<8x8xi32>
      %79 = arith.sitofp %78 : vector<8x8xi32> to vector<8x8xf32>
      %cst_18 = arith.constant dense<0.000000e+00> : vector<8xf32>
      %80 = vector.multi_reduction <add>, %79, %cst_18 [1] : vector<8x8xf32> to vector<8xf32>
      %81 = vector.shape_cast %80 : vector<8xf32> to vector<8x1xf32>
      %c0_19 = arith.constant 0 : index
      %c0_20 = arith.constant 0 : index
      %82 = vector.load %arg11[%c0_19, %c0_20] : memref<8x128xf32, #tpu.memory_space<vmem>>, vector<8x128xf32>
      %cst_21 = arith.constant 1.000000e+00 : f32
      %83 = vector.broadcast %cst_21 : f32 to vector<8x1xf32>
      %84 = arith.maximumf %81, %83 : vector<8x1xf32>
      %85 = vector.broadcast %84 : vector<8x1xf32> to vector<8x128xf32>
      %86 = arith.divf %82, %85 : vector<8x128xf32>
      %c0_22 = arith.constant 0 : index
      %c0_23 = arith.constant 0 : index
      %87 = vector.load %arg6[%c0_22, %c0_23] : memref<128x128xf32, #tpu.memory_space<vmem>>, vector<128x128xf32>
      %cst_24 = arith.constant dense<0.000000e+00> : vector<8x128xf32>
      %88 = tpu.matmul %86, %87, %cst_24 {dimension_numbers = #tpu.dot_dimension_numbers<[1], [0], [0], [1], [0, 0, 1, 1], [], []>} : vector<8x128xf32>, vector<128x128xf32>, vector<8x128xf32> -> vector<8x128xf32>
      %c0_25 = arith.constant 0 : index
      %c0_26 = arith.constant 0 : index
      %89 = vector.load %arg7[%c0_25, %c0_26] : memref<1x128xf32, #tpu.memory_space<vmem>>, vector<1x128xf32>
      %90 = vector.broadcast %89 : vector<1x128xf32> to vector<8x128xf32>
      %91 = arith.addf %88, %90 : vector<8x128xf32>
      %92 = tpu.iota {dimensions = array<i32: 1>} : vector<8x128xi32>
      %c4_i32 = arith.constant 4 : i32
      %93 = vector.broadcast %c4_i32 : i32 to vector<8x128xi32>
      %94 = arith.cmpi slt, %92, %93 : vector<8x128xi32>
      %cst_27 = arith.constant -1.000000e+30 : f32
      %95 = vector.broadcast %cst_27 : f32 to vector<8x128xf32>
      %96 = arith.select %94, %91, %95 : vector<8x128xi1>, vector<8x128xf32>
      %cst_28 = arith.constant dense<0xFF800000> : vector<8xf32>
      %97 = vector.multi_reduction <maximumf>, %96, %cst_28 [1] : vector<8x128xf32> to vector<8xf32>
      %98 = vector.shape_cast %97 : vector<8xf32> to vector<8x1xf32>
      %99 = vector.broadcast %98 : vector<8x1xf32> to vector<8x128xf32>
      %100 = arith.subf %96, %99 : vector<8x128xf32>
      %101 = math.exp %100 : vector<8x128xf32>
      %cst_29 = arith.constant dense<0.000000e+00> : vector<8xf32>
      %102 = vector.multi_reduction <add>, %101, %cst_29 [1] : vector<8x128xf32> to vector<8xf32>
      %103 = vector.shape_cast %102 : vector<8xf32> to vector<8x1xf32>
      %104 = math.log %103 : vector<8x1xf32>
      %105 = arith.addf %98, %104 : vector<8x1xf32>
      %c0_30 = arith.constant 0 : index
      %c0_31 = arith.constant 0 : index
      %106 = vector.load %arg4[%c0_30, %c0_31] : memref<8x1xi32, #tpu.memory_space<vmem>>, vector<8x1xi32>
      %107 = vector.broadcast %106 : vector<8x1xi32> to vector<8x128xi32>
      %108 = arith.cmpi eq, %92, %107 : vector<8x128xi32>
      %109 = arith.extui %108 : vector<8x128xi1> to vector<8x128xi32>
      %110 = arith.sitofp %109 : vector<8x128xi32> to vector<8x128xf32>
      %c0_32 = arith.constant 0 : index
      %c0_33 = arith.constant 0 : index
      %111 = vector.load %arg12[%c0_32, %c0_33] : memref<1x128xf32, #tpu.memory_space<vmem>>, vector<1x128xf32>
      %112 = vector.broadcast %105 : vector<8x1xf32> to vector<8x128xf32>
      %113 = arith.subf %112, %96 : vector<8x128xf32>
      %114 = arith.mulf %110, %113 : vector<8x128xf32>
      %cst_34 = arith.constant dense<0.000000e+00> : vector<128xf32>
      %115 = vector.multi_reduction <add>, %114, %cst_34 [0] : vector<8x128xf32> to vector<128xf32>
      %116 = vector.shape_cast %115 : vector<128xf32> to vector<1x128xf32>
      %117 = arith.addf %111, %116 : vector<1x128xf32>
      %c0_35 = arith.constant 0 : index
      %c0_36 = arith.constant 0 : index
      %118 = vector.load %arg12[%c0_35, %c0_36] : memref<1x128xf32, #tpu.memory_space<vmem>>, vector<1x128xf32>
      tpu.vector_store %arg12[%c0_35, %c0_36], %117 {strides = array<i32>} : memref<1x128xf32, #tpu.memory_space<vmem>>, vector<1x128xf32>,
    } else {
    }
    %c0_i32_14 = arith.constant 0 : i32
    %71 = arith.cmpi eq, %arg0, %c0_i32_14 : i32
    %c0_i32_15 = arith.constant 0 : i32
    %72 = arith.cmpi eq, %arg1, %c0_i32_15 : i32
    %73 = arith.andi %71, %72 : i1
    %74 = arith.extui %73 : i1 to i32
    %c0_i32_16 = arith.constant 0 : i32
    %75 = arith.cmpi ne, %74, %c0_i32_16 : i32
    scf.if %75 {
      %c0_17 = arith.constant 0 : index
      %c0_18 = arith.constant 0 : index
      %76 = vector.load %arg12[%c0_17, %c0_18] : memref<1x128xf32, #tpu.memory_space<vmem>>, vector<1x128xf32>
      %cst_19 = arith.constant dense<0.000000e+00> : vector<1xf32>
      %77 = vector.multi_reduction <add>, %76, %cst_19 [1] : vector<1x128xf32> to vector<1xf32>
      %78 = vector.shape_cast %77 : vector<1xf32> to vector<1x1xf32>
      %cst_20 = arith.constant 5.000000e-01 : f32
      %79 = vector.broadcast %cst_20 : f32 to vector<1x1xf32>
      %80 = arith.mulf %78, %79 : vector<1x1xf32>
      %81 = tpu.iota {dimensions = array<i32: 1>} : vector<1x128xi32>
      %c0_21 = arith.constant 0 : index
      %82 = memref.load %arg2[%c0_21] : memref<1xi32, #tpu.memory_space<smem>>
      %83 = vector.broadcast %82 : i32 to vector<1x128xi32>
      %84 = arith.cmpi eq, %81, %83 : vector<1x128xi32>
      %cst_22 = arith.constant 0.00999999977 : f32
      %85 = vector.broadcast %cst_22 : f32 to vector<1x1xf32>
      %86 = arith.mulf %85, %80 : vector<1x1xf32>
      %87 = math.exp %86 : vector<1x1xf32>
      %cst_23 = arith.constant 1.000000e+00 : f32
      %88 = vector.shape_cast %87 : vector<1x1xf32> to vector<1x1xf32>
      %89 = vector.broadcast %88 : vector<1x1xf32> to vector<1x128xf32>
      %90 = vector.broadcast %cst_23 : f32 to vector<1x128xf32>
      %91 = arith.select %84, %89, %90 : vector<1x128xi1>, vector<1x128xf32>
      %c0_24 = arith.constant 0 : index
      %c0_25 = arith.constant 0 : index
      %92 = vector.load %arg8[%c0_24, %c0_25] : memref<1x128xf32, #tpu.memory_space<vmem>>, vector<1x128xf32>
      %93 = arith.mulf %92, %91 : vector<1x128xf32>
      %cst_26 = arith.constant dense<0.000000e+00> : vector<1xf32>
      %94 = vector.multi_reduction <add>, %93, %cst_26 [1] : vector<1x128xf32> to vector<1xf32>
      %95 = vector.shape_cast %94 : vector<1xf32> to vector<1x1xf32>
      %96 = vector.broadcast %95 : vector<1x1xf32> to vector<1x128xf32>
      %97 = arith.divf %93, %96 : vector<1x128xf32>
      %c0_27 = arith.constant 0 : index
      %c0_28 = arith.constant 0 : index
      %98 = vector.load %arg9[%c0_27, %c0_28] : memref<1x128xf32, #tpu.memory_space<vmem>>, vector<1x128xf32>
      tpu.vector_store %arg9[%c0_27, %c0_28], %97 {strides = array<i32>} : memref<1x128xf32, #tpu.memory_space<vmem>>, vector<1x128xf32>,
      %cst_29 = arith.constant 0.000000e+00 : f32
      %99 = vector.broadcast %cst_29 : f32 to vector<1x128xf32>
      %100 = arith.select %84, %97, %99 : vector<1x128xi1>, vector<1x128xf32>
      %cst_30 = arith.constant dense<0.000000e+00> : vector<1xf32>
      %101 = vector.multi_reduction <add>, %100, %cst_30 [1] : vector<1x128xf32> to vector<1xf32>
      %102 = vector.shape_cast %101 : vector<1xf32> to vector<1x1xf32>
      %103 = arith.mulf %80, %102 : vector<1x1xf32>
      %104 = tpu.iota {dimensions = array<i32: 1>} : vector<1x128xi32>
      %c0_i32_31 = arith.constant 0 : i32
      %105 = vector.broadcast %c0_i32_31 : i32 to vector<1x128xi32>
      %106 = arith.cmpi eq, %104, %105 : vector<1x128xi32>
      %c1_i32 = arith.constant 1 : i32
      %107 = vector.broadcast %c1_i32 : i32 to vector<1x128xi32>
      %108 = arith.cmpi eq, %104, %107 : vector<1x128xi32>
      %cst_32 = arith.constant 0.000000e+00 : f32
      %109 = vector.shape_cast %103 : vector<1x1xf32> to vector<1x1xf32>
      %110 = vector.broadcast %109 : vector<1x1xf32> to vector<1x128xf32>
      %111 = vector.broadcast %cst_32 : f32 to vector<1x128xf32>
      %112 = arith.select %108, %110, %111 : vector<1x128xi1>, vector<1x128xf32>
      %113 = vector.shape_cast %80 : vector<1x1xf32> to vector<1x1xf32>
      %114 = vector.broadcast %113 : vector<1x1xf32> to vector<1x128xf32>
      %115 = arith.select %106, %114, %112 : vector<1x128xi1>, vector<1x128xf32>
      %c0_33 = arith.constant 0 : index
      %c0_34 = arith.constant 0 : index
      %116 = vector.load %arg10[%c0_33, %c0_34] : memref<1x128xf32, #tpu.memory_space<vmem>>, vector<1x128xf32>
      tpu.vector_store %arg10[%c0_33, %c0_34], %115 {strides = array<i32>} : memref<1x128xf32, #tpu.memory_space<vmem>>, vector<1x128xf32>,
    } else {
    }
    return
  }
  func.func @transform_0(%arg0: i32, %arg1: i32, %arg2: memref<1xi32, #tpu.memory_space<smem>>) -> (i32, i32) {
    %c0_i32 = arith.constant 0 : i32
    %c0_i32_0 = arith.constant 0 : i32
    return %arg0, %c0_i32 : i32, i32
  }
  func.func @transform_1(%arg0: i32, %arg1: i32, %arg2: memref<1xi32, #tpu.memory_space<smem>>) -> (i32, i32) {
    %c0_i32 = arith.constant 0 : i32
    %c0_i32_0 = arith.constant 0 : i32
    return %arg0, %c0_i32 : i32, i32
  }
  func.func @transform_2(%arg0: i32, %arg1: i32, %arg2: memref<1xi32, #tpu.memory_space<smem>>) -> (i32, i32) {
    %c0_i32 = arith.constant 0 : i32
    %c0_i32_0 = arith.constant 0 : i32
    return %arg1, %c0_i32 : i32, i32
  }
  func.func @transform_3(%arg0: i32, %arg1: i32, %arg2: memref<1xi32, #tpu.memory_space<smem>>) -> (i32, i32) {
    %c0_i32 = arith.constant 0 : i32
    %c0_i32_0 = arith.constant 0 : i32
    %c0_i32_1 = arith.constant 0 : i32
    return %c0_i32, %c0_i32_0 : i32, i32
  }
  func.func @transform_4(%arg0: i32, %arg1: i32, %arg2: memref<1xi32, #tpu.memory_space<smem>>) -> (i32, i32) {
    %c0_i32 = arith.constant 0 : i32
    %c0_i32_0 = arith.constant 0 : i32
    %c0_i32_1 = arith.constant 0 : i32
    return %c0_i32, %c0_i32_0 : i32, i32
  }
  func.func @transform_5(%arg0: i32, %arg1: i32, %arg2: memref<1xi32, #tpu.memory_space<smem>>) -> (i32, i32) {
    %c0_i32 = arith.constant 0 : i32
    %c0_i32_0 = arith.constant 0 : i32
    %c0_i32_1 = arith.constant 0 : i32
    return %c0_i32, %c0_i32_0 : i32, i32
  }
  func.func @transform_6(%arg0: i32, %arg1: i32, %arg2: memref<1xi32, #tpu.memory_space<smem>>) -> (i32, i32) {
    %c0_i32 = arith.constant 0 : i32
    %c0_i32_0 = arith.constant 0 : i32
    %c0_i32_1 = arith.constant 0 : i32
    return %c0_i32, %c0_i32_0 : i32, i32
  }
  func.func @transform_7(%arg0: i32, %arg1: i32, %arg2: memref<1xi32, #tpu.memory_space<smem>>) -> (i32, i32) {
    %c0_i32 = arith.constant 0 : i32
    %c0_i32_0 = arith.constant 0 : i32
    %c0_i32_1 = arith.constant 0 : i32
    return %c0_i32, %c0_i32_0 : i32, i32
  }
}

</mosaic_0001>

<bundles_post_ra>
// kernel: tpu_custom_call.1
= control target key start
LH: loop header
LB: loop body
LE: loop exit
PB: predicated region body
PF: predicated region fallthrough
CT: control target
= control target key end

     0   :  { %15 = vsyncpa [#allocation7], 0  ;;  %s710_s0 = inlined_call_operand.<no memory space> [shape: s32[1], index: 0, kind: input, shape index: {}]   ;;  %s711_s1 = inlined_call_operand.vmem [shape: s32[8,8], index: 1, kind: input, shape index: {}]   ;;  %s712_s2 = inlined_call_operand.vmem [shape: s32[8,1], index: 2, kind: input, shape index: {}]   ;;  %s713_s3 = inlined_call_operand.hbm [shape: bf16[128,128], index: 3, kind: input, shape index: {}]   ;;  %s714_s4 = inlined_call_operand.hbm [shape: f32[128,128], index: 4, kind: input, shape index: {}]   ;;  %s715_s5 = inlined_call_operand.vmem [shape: f32[1,128], index: 5, kind: input, shape index: {}]   ;;  %s716_s6 = inlined_call_operand.vmem [shape: f32[1,128], index: 6, kind: input, shape index: {}]   ;;  %s717_s7 = inlined_call_operand.hbm [shape: f32[1,128], index: 7, kind: output, shape index: {0}]   ;;  %s718_s8 = inlined_call_operand.hbm [shape: f32[1,128], index: 8, kind: output, shape index: {1}]  }
   0x1   :  { %16 = vsyncpa [#allocation10], 0 }
   0x2   :  { %17 = vsyncpa [#allocation8], 0 }
   0x3   :  { %18 = vsyncpa [#allocation13], 0  ;;  %s27_s29 = sshll.u32 %s713_s3, 4  ;;  %s584_s30 = smov [#allocation6]   ;;  %s28_s29 = int_to_ptr.hbm [resolvable:$true] %s27_s29 }
   0x4   :  { %s29_s9 = sshll.u32 %s584_s30, 4  ;;  %s40_s12 = sshll.u32 %s714_s4, 4  ;;  %s30_s9 = int_to_ptr.vmem [resolvable:$true] %s29_s9  ;;  %s41_s12 = int_to_ptr.hbm [resolvable:$true] %s40_s12 }
   0x5   :  { %s585_s13 = smov 64   ;;  %s586_s14 = smov 4  }
   0x6   :  { %35 = dma.hbm_to_vmem [thread:$0]  %s28_s29, 1024, %s30_s9, [#allocation7], %s585_s13, %s585_s13, %s586_s14  }
   0x7   :  { %s587_s15 = smov [#allocation9]   ;;  %s588_s17 = smov 128  }
   0x8   :  { %s42_s16 = sshll.u32 %s587_s15, 4  ;;  %s589_s18 = smov 8   ;;  %s43_s16 = int_to_ptr.vmem [resolvable:$true] %s42_s16 }
   0x9   :  { %48 = dma.hbm_to_vmem [thread:$0]  %s41_s12, 2048, %s43_s16, [#allocation10], %s588_s17, %s588_s17, %s589_s18  }
   0xa   :  { %576 = dma.done.wait [#allocation7], 1024  }
   0xb   :  { %577 = vsyncadd [#allocation7], 4294966272 }
   0xc   :  { %578 = dma.done.wait [#allocation10], 2048  }
   0xd   :  { %579 = vsyncadd [#allocation10], 4294965248  ;;  %v590_v0 = vmov 0   ;;  %v591_v1 = vmov 2   ;;  %v592_v2 = vmov 4   ;;  %v593_v3 = vmov 0.0  }
   0xe   :  { %459 = vset.pattern.permute.xlu0 %v590_v0  ;;  %461 = vset.pattern.permute.xlu1 %v591_v1  ;;  %67 = vst [vmem:[#allocation3] sm:$0x1] %v593_v3  ;;  %v72_v4 = vld [vmem:[%s711_s1] sm:$0xff]  ;;  %v594_v6 = vmov 1   ;;  %v595_v7 = vmov 3   ;;  %v596_v8 = vmov 5   ;;  %v73_v21 = vlaneseq }
   0xf   :  { %463 = vset.pattern.permute.xlu2 %v592_v2  ;;  %v441_v5 = vld [vmem:[#allocation6 + $0x38] sm:$0xff]  ;;  %79 = vperm.xlu0 %459, %v72_v4   ;;  %v597_v9 = vmov 6   ;;  %v598_v10 = vmov 7   ;;  %v440_v11 = vld [vmem:[#allocation6 + $0x30] sm:$0xff]  ;;  %v439_v12 = vld [vmem:[#allocation6 + $0x28] sm:$0xff]  ;;  %vm218_vm0 = vcmp.ge.s32.totalorder %v72_v4, 0 }
  0x10   :  { %93 = vperm.xlu1 %461, %v72_v4   ;;  %107 = vperm.xlu2 %463, %v72_v4   ;;  %vm221_vm1 = vcmask 64512   ;;  %v432_v13 = vsel %vm218_vm0, 1.0, %v593_v3  ;;  %v438_v15 = vld [vmem:[#allocation6 + $0x20] sm:$0xff]  ;;  %v437_v16 = vld [vmem:[#allocation6 + $0x18] sm:$0xff]  ;;  %v436_v17 = vld [vmem:[#allocation6 + $0x10] sm:$0xff]  ;;  %v657_v24 = vand.u32 127, %v73_v21 }
  0x11   :  { %200 = vmatpush.bf16.msra.mxu0 %v441_v5  ;;  %v222_v14 = vsel %vm221_vm1, %v432_v13, 0.0  ;;  %v435_v18 = vld [vmem:[#allocation6 + $0x8] sm:$0xff]  ;;  %v434_v19 = vld [vmem:[#allocation6] sm:$0xff]  ;;  %v257_v46 = vld [vmem:[#allocation9 + $0x78] sm:$0xff]  ;;  %vm315_vm0 = vcmask 1040384   ;;  %s365_s26 = sshll.u32 %s717_s7, 4  ;;  %s366_s26 = int_to_ptr.hbm [resolvable:$true] %s365_s26 }
  0x12   :  { %v256_v47 = vld [vmem:[#allocation9 + $0x70] sm:$0xff]  ;;  %262 = vmatpush.msra.mxu1 %v257_v46  ;;  %v255_v48 = vld [vmem:[#allocation9 + $0x68] sm:$0xff]  ;;  %v254_v49 = vld [vmem:[#allocation9 + $0x60] sm:$0xff]  ;;  %vm282_vm14 = vcmp.lt.s32.totalorder %v657_v24, 4  ;;  %s600_s27 = smov [#allocation12]   ;;  %s376_s30 = sshll.u32 %s718_s8, 4  ;;  %s377_s30 = int_to_ptr.hbm [resolvable:$true] %s376_s30 }
  0x13   :  { %v253_v50 = vld [vmem:[#allocation9 + $0x58] sm:$0xff]  ;;  %v252_v51 = vld [vmem:[#allocation9 + $0x50] sm:$0xff]  ;;  %v251_v52 = vld [vmem:[#allocation9 + $0x48] sm:$0xff]  ;;  %s374_s28 = sshll.u32 %s600_s27, 4  ;;  %s375_s28 = int_to_ptr.vmem [resolvable:$true] %s374_s28 }
  0x14   :  { %263 = vmatpush.msra.mxu1 %v256_v47  ;;  %v250_v53 = vld [vmem:[#allocation9 + $0x40] sm:$0xff]  ;;  %v249_v54 = vld [vmem:[#allocation9 + $0x38] sm:$0xff]  ;;  %v248_v55 = vld [vmem:[#allocation9 + $0x30] sm:$0xff] }
  0x15   :  { %201 = vmatpush.bf16.msra.mxu0 %v440_v11  ;;  %v247_v56 = vld [vmem:[#allocation9 + $0x28] sm:$0xff]  ;;  %v246_v57 = vld [vmem:[#allocation9 + $0x20] sm:$0xff]  ;;  %v245_v58 = vld [vmem:[#allocation9 + $0x18] sm:$0xff] }
  0x16   :  { %264 = vmatpush.msra.mxu1 %v255_v48  ;;  %v244_v59 = vld [vmem:[#allocation9 + $0x10] sm:$0xff]  ;;  %v243_v61 = vld [vmem:[#allocation9 + $0x8] sm:$0xff]  ;;  %v242_v63 = vld [vmem:[#allocation9] sm:$0xff] }
  0x17   :  { %460 = vset.pattern.permute.xlu0 %v594_v6  ;;  %v327_v47 = vld [vmem:[%s716_s6] sm:$0x1] }
  0x18   :  { %462 = vset.pattern.permute.xlu1 %v595_v7  ;;  %86 = vperm.xlu0 %460, %v72_v4  }
  0x19   :  { %100 = vperm.xlu1 %462, %v72_v4   ;;  %464 = vset.pattern.permute.xlu2 %v596_v8 }
  0x1a   :  { %114 = vperm.xlu2 %464, %v72_v4   ;;  %202 = vmatpush.bf16.msra.mxu0 %v439_v12 }
  0x1b   :  { %265 = vmatpush.msra.mxu1 %v254_v49 }
  0x1d   :  { %266 = vmatpush.msra.mxu1 %v253_v50 }
  0x1e   :  { %203 = vmatpush.bf16.msra.mxu0 %v438_v15 }
  0x1f   :  { %267 = vmatpush.msra.mxu1 %v252_v51 }
  0x20   :  { %468 = vset.pattern.permute.xlu0 %v590_v0 }
  0x21   :  { %465 = vset.pattern.permute.xlu1 %v597_v9  ;;  %268 = vmatpush.msra.mxu1 %v251_v52 }
  0x22   :  { %121 = vperm.xlu1 %465, %v72_v4   ;;  %466 = vset.pattern.permute.xlu2 %v598_v10 }
  0x23   :  { %128 = vperm.xlu2 %466, %v72_v4   ;;  %204 = vmatpush.bf16.msra.mxu0 %v437_v16 }
  0x24   :  { %269 = vmatpush.msra.mxu1 %v250_v53 }
  0x26   :  { %270 = vmatpush.msra.mxu1 %v249_v54 }
  0x27   :  { %205 = vmatpush.bf16.msra.mxu0 %v436_v17 }
  0x28   :  { %271 = vmatpush.msra.mxu1 %v248_v55 }
  0x2a   :  { %272 = vmatpush.msra.mxu1 %v247_v56 }
  0x2b   :  { %467 = vset.pattern.permute.xlu2 %v590_v0  ;;  %206 = vmatpush.bf16.msra.mxu0 %v435_v18 }
  0x2c   :  { %273 = vmatpush.msra.mxu1 %v246_v57 }
  0x2e   :  { %274 = vmatpush.msra.mxu1 %v245_v58 }
  0x2f   :  { %207 = vmatpush.bf16.msra.mxu0 %v434_v19 }
  0x30   :  { %275 = vmatpush.msra.mxu1 %v244_v59 }
  0x32   :  { %276 = vmatpush.msra.mxu1 %v243_v61 }
  0x34   :  { %277 = vmatpush.msra.mxu1 %v242_v63 }
  0x42   :  { %223 = vadd.xlane.f32.xlu0 %v222_v14  ;;  %v469_v14 = vld [vmem:[%s715_s5] ss:$0 sm:$0xff] }
  0x6a   :  { %v108_v20 = vpop.permute.xlu2 %107 }
  0x6b   :  { %vm109_vm6 = vcmp.eq.s32.totalorder %v108_v20, %v657_v24 }
  0x6c   :  { %v396_v36 = vsel %vm109_vm6, 1.0, %v593_v3  ;;  %vm354_vm6 = vcmp.eq.s32.totalorder %v657_v24, 1 }
  0x74   :  { %v115_v25 = vpop.permute.xlu2 %114 }
  0x75   :  { %vm116_vm7 = vcmp.eq.s32.totalorder %v115_v25, %v657_v24 }
  0x76   :  { %v397_v39 = vsel %vm116_vm7, 1.0, %v593_v3  ;;  %vm353_vm7 = vcmp.eq.s32.totalorder %v657_v24, 0 }
  0x7d   :  { %v129_v34 = vpop.permute.xlu2 %128 }
  0x7e   :  { %vm130_vm8 = vcmp.eq.s32.totalorder %v129_v34, %v657_v24 }
  0x7f   :  { %v399_v42 = vsel %vm130_vm8, 1.0, %v593_v3 }
  0x81   :  { %v80_v22 = vpop.permute.xlu0 %79 }
  0x82   :  { %v94_v23 = vpop.permute.xlu1 %93  ;;  %vm81_vm2 = vcmp.eq.s32.totalorder %v80_v22, %v657_v24  ;;  %v294_v22 = vld [vmem:[%s712_s2] sm:$0xff] }
  0x83   :  { %vm95_vm3 = vcmp.eq.s32.totalorder %v94_v23, %v657_v24  ;;  %v392_v28 = vsel %vm81_vm2, 1.0, %v593_v3 }
  0x84   :  { %v394_v31 = vsel %vm95_vm3, 1.0, %v593_v3 }
  0x8a   :  { %v87_v26 = vpop.permute.xlu0 %86 }
  0x8b   :  { %v101_v27 = vpop.permute.xlu1 %100  ;;  %vm88_vm4 = vcmp.eq.s32.totalorder %v87_v26, %v657_v24 }
  0x8c   :  { %v393_v29 = vsel %vm88_vm4, 1.0, %v593_v3  ;;  %vm102_vm5 = vcmp.eq.s32.totalorder %v101_v27, %v657_v24 }
  0x8d   :  { %v91_v30 = vadd.f32 %v393_v29, %v392_v28  ;;  %v395_v33 = vsel %vm102_vm5, 1.0, %v593_v3 }
  0x8f   :  { %v98_v32 = vadd.f32 %v394_v31, %v91_v30 }
  0x91   :  { %v105_v35 = vadd.f32 %v395_v33, %v98_v32 }
  0x93   :  { %v112_v37 = vadd.f32 %v396_v36, %v105_v35 }
  0x94   :  { %v122_v38 = vpop.permute.xlu1 %121 }
  0x95   :  { %vm123_vm9 = vcmp.eq.s32.totalorder %v122_v38, %v657_v24  ;;  %v119_v40 = vadd.f32 %v397_v39, %v112_v37  ;;  %v301_v37 = vld [vmem:[#allocation3] sm:$0x1] }
  0x96   :  { %v398_v41 = vsel %vm123_vm9, 1.0, %v593_v3 }
  0x97   :  { %v126_v43 = vadd.f32 %v398_v41, %v119_v40 }
  0x99   :  { %v133_v44 = vadd.f32 %v399_v42, %v126_v43 }
  0x9b   :  { %v135_v45 = vpack.c.bf16 %v133_v44, %v133_v44 }
  0x9d   :  { %208 = vmatmul.bf16.vlgmr.msra.gmra.mxu0 %v135_v45  ;;  %v321_v45 = vstv %s710_s0  ;;  %s599_s0 = smov [#allocation11]  }
  0x9e   :  { %vm689_vm1 = vcmp.eq.s32.totalorder %v657_v24, %v321_v45  ;;  %s363_s6 = sshll.u32 %s599_s0, 4  ;;  %s364_s6 = int_to_ptr.vmem [resolvable:$true] %s363_s6 }
  0xb5   :  { %v224_v60 = vpop.xlane.xlu0 %223 }
  0xb6   :  { %v226_v62 = vmax.f32 %v224_v60, 1.0 }
  0xb8   :  { %470 = vrcp.f32 %v226_v62  ;;  %vm232_vm10 = vweird.f32 %v226_v62  ;;  %v238_v5 = vand.u32 2147483648, %v226_v62  ;;  %v236_v7 = vand.u32 2147483647, %v226_v62 }
  0xba   :  { %v239_v8 = vor.u32 1.1754944e-38, %v238_v5  ;;  %vm237_vm13 = vcmp.eq.f32.partialorder %v236_v7, 8.507059e+37 }
  0xbe   :  { %v471_v0 = vpop.eup %470 }
  0xbf   :  { %v228_v1 = vmul.f32 %v471_v0, %v226_v62  ;;  %vm233_vm11 = vweird.f32 %v471_v0 }
  0xc0   :  { %vm234_vm12 = vmor %vm232_vm10, %vm233_vm11 }
  0xc1   :  { %v229_v2 = vsub.f32 1.0, %v228_v1 }
  0xc3   :  { %v230_v4 = vmul.f32 %v471_v0, %v229_v2 }
  0xc5   :  { %v231_v6 = vadd.f32 %v471_v0, %v230_v4 }
  0xc7   :  { %v235_v9 = vsel %vm234_vm12, %v471_v0, %v231_v6 }
  0xc8   :  { %v240_v11 = vsel %vm237_vm13, %v239_v8, %v235_v9 }
 0x11a   :  { %v209_v10 = vpop.f32.mrf.mxu0 }
 0x11b   :  { %v241_v12 = vmul.f32 %v240_v11, %v209_v10 }
 0x11d   :  { %278 = vmatmul.f32.vlgmr.msra.gmra.mxu1 %v241_v12 }
 0x122   :  { %v211_v13 = vpop.f32.mrf.mxu0 }
 0x19a   :  { %v279_v15 = vpop.f32.mrf.mxu1 }
 0x19b   :  { %v280_v16 = vadd.f32 %v469_v14, %v279_v15 }
 0x19d   :  { %v283_v17 = vsel %vm282_vm14, %v280_v16, -1e+30 }
 0x19e   :  { %284 = vmax.xlane.f32.xlu1 %v283_v17 }
 0x211   :  { %v285_v18 = vpop.xlane.xlu1 %284 }
 0x212   :  { %v286_v19 = vsub.f32 %v283_v17, %v285_v18 }
 0x214   :  { %v287_v20 = vmul.f32 1.442695, %v286_v19 }
 0x216   :  { %472 = vpow2.f32 %v287_v20 }
 0x21c   :  { %v473_v21 = vpop.eup %472 }
 0x21d   :  { %289 = vadd.xlane.f32.xlu2 %v473_v21 }
 0x235   :  { %296 = vperm.xlu2 %467, %v294_v22  }
 0x290   :  { %v290_v23 = vpop.xlane.xlu2 %289 }
 0x291   :  { %474 = vlog2.f32 %v290_v23 }
 0x297   :  { %v475_v25 = vpop.eup %474 }
 0x298   :  { %v292_v26 = vmul.f32 0.6931472, %v475_v25  ;;  %v297_v27 = vpop.permute.xlu2 %296 }
 0x299   :  { %vm298_vm15 = vcmp.eq.s32.totalorder %v657_v24, %v297_v27 }
 0x29a   :  { %v293_v28 = vadd.f32 %v292_v26, %v285_v18  ;;  %v433_v29 = vsel %vm298_vm15, 1.0, %v593_v3 }
 0x29c   :  { %v302_v30 = vsub.f32 %v293_v28, %v283_v17 }
 0x29e   :  { %v303_v31 = vmul.f32 %v433_v29, %v302_v30 }
 0x2a0   :  { %v304_v32 = vrot.slane %v303_v31, 4 }
 0x2a2   :  { %v305_v33 = vadd.f32 %v304_v32, %v303_v31 }
 0x2a4   :  { %v306_v34 = vrot.slane %v305_v33, 2 }
 0x2a6   :  { %v307_v35 = vadd.f32 %v306_v34, %v305_v33 }
 0x2a8   :  { %v308_v36 = vrot.slane %v307_v35, 1 }
 0x2aa   :  { %v309_v38 = vadd.f32 %v308_v36, %v307_v35 }
 0x2ac   :  { %v310_v39 = vadd.f32 %v309_v38, %v301_v37 }
 0x2ae   :  { %311 = vst [vmem:[#allocation3] sm:$0x1] %v310_v39 }
 0x2b5   :  { %v314_v40 = vld [vmem:[#allocation3] sm:$0x1] }
 0x2b6   :  { %v316_v41 = vsel %vm315_vm0, %v314_v40, 0.0 }
 0x2b7   :  { %317 = vadd.xlane.f32.xlu0 %v316_v41 }
 0x32a   :  { %v318_v42 = vpop.xlane.xlu0 %317 }
 0x32b   :  { %v319_v43 = vmul.f32 0.5, %v318_v42 }
 0x32d   :  { %v323_v44 = vmul.f32 0.01, %v319_v43 }
 0x32f   :  { %v324_v3 = vmul.f32 1.442695, %v323_v44 }
 0x331   :  { %476 = vpow2.f32 %v324_v3 }
 0x337   :  { %v477_v48 = vpop.eup %476 }
 0x338   :  { %v326_v49 = vsel %vm689_vm1, %v477_v48, 1.0 }
 0x339   :  { %v328_v50 = vmul.f32 %v327_v47, %v326_v49 }
 0x33b   :  { %v329_v51 = vsel %vm315_vm0, %v328_v50, 0.0 }
 0x33c   :  { %330 = vadd.xlane.f32.xlu1 %v329_v51 }
 0x3af   :  { %v331_v52 = vpop.xlane.xlu1 %330 }
 0x3b0   :  { %478 = vrcp.f32 %v331_v52  ;;  %v343_v56 = vand.u32 2147483648, %v331_v52  ;;  %v341_v58 = vand.u32 2147483647, %v331_v52  ;;  %vm337_vm3 = vweird.f32 %v331_v52 }
 0x3b2   :  { %v344_v60 = vor.u32 1.1754944e-38, %v343_v56  ;;  %vm342_vm5 = vcmp.eq.f32.partialorder %v341_v58, 8.507059e+37 }
 0x3b6   :  { %v479_v53 = vpop.eup %478 }
 0x3b7   :  { %v333_v54 = vmul.f32 %v479_v53, %v331_v52  ;;  %vm338_vm2 = vweird.f32 %v479_v53 }
 0x3b8   :  { %vm339_vm4 = vmor %vm337_vm3, %vm338_vm2 }
 0x3b9   :  { %v334_v55 = vsub.f32 1.0, %v333_v54 }
 0x3bb   :  { %v335_v57 = vmul.f32 %v479_v53, %v334_v55 }
 0x3bd   :  { %v336_v59 = vadd.f32 %v479_v53, %v335_v57 }
 0x3bf   :  { %v340_v61 = vsel %vm339_vm4, %v479_v53, %v336_v59 }
 0x3c0   :  { %v345_v62 = vsel %vm342_vm5, %v344_v60, %v340_v61 }
 0x3c1   :  { %v346_v63 = vmul.f32 %v345_v62, %v328_v50 }
 0x3c3   :  { %v348_v0 = vsel %vm689_vm1, %v346_v63, 0.0  ;;  %347 = vst [vmem:[#allocation11] sm:$0x1] %v346_v63 }
 0x3c4   :  { %v349_v1 = vsel %vm315_vm0, %v348_v0, 0.0  ;;  %368 = dma.vmem_to_hbm [thread:$0]  %s364_s6, 16, %s366_s26, [#allocation8]  }
 0x3c5   :  { %350 = vadd.xlane.f32.xlu0 %v349_v1 }
 0x438   :  { %v351_v2 = vpop.xlane.xlu0 %350 }
 0x439   :  { %v352_v4 = vmul.f32 %v351_v2, %v319_v43 }
 0x43b   :  { %v355_v5 = vsel %vm354_vm6, %v352_v4, 0.0 }
 0x43c   :  { %v356_v6 = vsel %vm353_vm7, %v319_v43, %v355_v5 }
 0x43d   :  { %357 = vst [vmem:[#allocation12] sm:$0x1] %v356_v6 }
 0x43e   :  { %379 = dma.vmem_to_hbm [thread:$0]  %s375_s28, 16, %s377_s30, [#allocation13]  }
 0x43f   :  { %580 = dma.done.wait [#allocation8], 16  }
 0x440   :  { %581 = vsyncadd [#allocation8], 4294967280 }
 0x441   :  { %582 = dma.done.wait [#allocation13], 16  }
 0x442   :  { %583 = vsyncadd [#allocation13], 4294967280 }
 0x443   :  { %388 = vsyncpa [#allocation7], 1 }
 0x444   :  { %389 = vsyncpa [#allocation10], 1 }
 0x445   :  { %390 = vsyncpa [#allocation8], 1 }
 0x446   :  { %391 = vsyncpa [#allocation13], 1 }

</bundles_post_ra>
